<compile_context>
chip_gen: v6e
topology: v6e:2x2x1
jax: 0.10.0
libtpu: 0.0.40
codegen_flags: <defaults>
</compile_context>

<pallas_src>
import math

import jax
import jax.numpy as jnp
from jax import lax
from jax.experimental import pallas as pl
from jax.experimental.pallas import tpu as pltpu


def _round_up(n: int, m: int) -> int:
    return ((n + m - 1) // m) * m


def dense_kernel(x_ref, w_ref, b_ref, o_ref):
    # x_ref: (TB, 128)  batch on sublanes, features on lanes (streamed per tile)
    # w_ref: (1, 128)   fused weight row, resident across grid steps
    # b_ref: (1,)       fused bias scalar in SMEM
    # o_ref: (1, TB)    batch on the lane axis -> lane-dense, unmasked stores
    #
    # Contract the feature (lane) axis of both operands ("NT" matvec):
    # (1, 128) x (TB, 128)^T -> (1, TB).  The kernel is HBM-bound streaming x,
    # so the MXU is otherwise idle; using it here puts the batch dim on lanes,
    # giving lane-dense writeback instead of (TB, 1) masked partial stores.
    y = lax.dot_general(
        w_ref[...], x_ref[...],
        dimension_numbers=(((1,), (1,)), ((), ())),
        preferred_element_type=jnp.float32,
    )
    y = y + b_ref[0]
    # sigmoid: exp on the EUP; approximate reciprocal also on the EUP slot
    # instead of a VALU Newton-iteration divide.
    o_ref[...] = pl.reciprocal(1.0 + jnp.exp(-y), approx=True).astype(o_ref.dtype)


def dense_layers(x, w1, b1, w2, b2, *, tb: int = 512):
    """sigmoid(fc2(fc1(x))); weights pre-transposed to (in_features, out_features).

    Returns (B, 1) float32, matching the PyTorch module's output.
    """
    assert tb % 128 == 0, "batch tile must be a multiple of the 128-lane width"
    B, F = x.shape
    assert F == 128

    # --- Fuse the two affine layers (no activation between them) -------------
    w_eff = w1 @ w2                                        # (128, 1)
    w_row = w_eff.reshape(1, 128).astype(x.dtype)          # w_row[0, f] = w_eff[f, 0]
    b_eff = (b1 @ w2 + b2).reshape(1).astype(jnp.float32)  # scalar, lives in SMEM

    # --- Batch tiling ---------------------------------------------------------
    # TB in the 512-2048 range amortizes per-grid-step overhead; the x tile is
    # TB*512 B (double-buffered), tiny even under v7x's 64 MiB VMEM.
    tile = min(tb, _round_up(B, 8))
    b_pad = _round_up(B, tile)
    if b_pad != B:
        x = jnp.pad(x, ((0, b_pad - B), (0, 0)))
    grid = (b_pad // tile,)

    out = pl.pallas_call(
        dense_kernel,
        out_shape=jax.ShapeDtypeStruct((1, b_pad), jnp.float32),
        grid_spec=pltpu.PrefetchScalarGridSpec(
            num_scalar_prefetch=0,
            grid=grid,
            in_specs=[
                pl.BlockSpec((tile, 128), lambda i: (i, 0)),        # x: streamed
                pl.BlockSpec((1, 128), lambda i: (0, 0)),           # w_row: resident
                pl.BlockSpec(memory_space=pltpu.MemorySpace.SMEM),  # b_eff: SMEM scalar
            ],
            out_specs=pl.BlockSpec((1, tile), lambda i: (0, i)),    # lane-dense output
        ),
        compiler_params=pltpu.CompilerParams(
            dimension_semantics=("parallel",),  # shard batch tiles across TCs (v7x)
            vmem_limit_bytes=32 * 1024 * 1024,  # explicit limit with ample headroom
        ),
    )(x, w_row, b_eff)

    # (1, B_pad) lane-dense slab -> (B, 1), dropping the padded rows.
    return out.reshape(b_pad, 1)[:B]


def init_params(key):
    """Deterministic init matching nn.Linear's U(-1/sqrt(fan_in), 1/sqrt(fan_in))."""
    k1, k2, k3, k4 = jax.random.split(key, 4)
    bound1 = 1.0 / math.sqrt(128.0)
    bound2 = 1.0 / math.sqrt(32.0)
    # Stored already transposed: (in_features, out_features).
    w1 = jax.random.uniform(k1, (128, 32), jnp.float32, -bound1, bound1)
    b1 = jax.random.uniform(k2, (1, 32), jnp.float32, -bound1, bound1)
    w2 = jax.random.uniform(k3, (32, 1), jnp.float32, -bound2, bound2)
    b2 = jax.random.uniform(k4, (1, 1), jnp.float32, -bound2, bound2)
    return w1, b1, w2, b2


if __name__ == "__main__":
    key = jax.random.PRNGKey(0)
    kx, kp = jax.random.split(key)
    # Non-multiple of the 512 tile: exercises wrapper padding + a 3-step grid.
    B = 1037
    x = jax.random.normal(kx, (B, 128), jnp.float32)
    w1, b1, w2, b2 = init_params(kp)

    out = dense_layers(x, w1, b1, w2, b2)
    jax.block_until_ready(out)

    # Pure-JAX reference check (tolerance loosened slightly for the EUP
    # approximate-reciprocal sigmoid).
    ref = jax.nn.sigmoid((x @ w1 + b1) @ w2 + b2)
    assert out.shape == (B, 1)
    err = float(jnp.max(jnp.abs(out - ref)))
    assert err < 5e-3, err

    print("KERNEL_OK")
</pallas_src>

<mosaic_0001>
module attributes {stable_mosaic.version = 11 : i64} {
  func.func @dense_kernel(%arg0: i32, %arg1: memref<512x128xf32, #tpu.memory_space<vmem>>, %arg2: memref<1x128xf32, #tpu.memory_space<vmem>>, %arg3: memref<1xf32, #tpu.memory_space<smem>>, %arg4: memref<1x512xf32, #tpu.memory_space<vmem>>) attributes {dimension_semantics = [#tpu.dimension_semantics<parallel>], iteration_bounds = array<i64: 3>, scalar_prefetch = 0 : i64, scratch_operands = 0 : i64, tpu.core_type = #tpu.core_type<tc>, window_params = [{transform_indices = @transform_0, window_bounds = array<i64: 512, 128>}, {pipeline_mode = #tpu.pipeline_mode<synchronous>, transform_indices = @transform_1, window_bounds = array<i64: 1, 128>}, {transform_indices = @transform_2, window_bounds = array<i64: 1>}, {transform_indices = @transform_3, window_bounds = array<i64: 1, 512>}]} {
    %c0 = arith.constant 0 : index
    %c0_0 = arith.constant 0 : index
    %0 = vector.load %arg2[%c0, %c0_0] : memref<1x128xf32, #tpu.memory_space<vmem>>, vector<1x128xf32>
    %c0_1 = arith.constant 0 : index
    %c0_2 = arith.constant 0 : index
    %1 = vector.load %arg1[%c0_1, %c0_2] : memref<512x128xf32, #tpu.memory_space<vmem>>, vector<512x128xf32>
    %cst = arith.constant dense<0.000000e+00> : vector<1x512xf32>
    %2 = tpu.matmul %0, %1, %cst {dimension_numbers = #tpu.dot_dimension_numbers<[1], [1], [0], [0], [0, 0, 1, 0], [], []>} : vector<1x128xf32>, vector<512x128xf32>, vector<1x512xf32> -> vector<1x512xf32>
    %c0_3 = arith.constant 0 : index
    %3 = memref.load %arg3[%c0_3] : memref<1xf32, #tpu.memory_space<smem>>
    %4 = vector.broadcast %3 : f32 to vector<1x512xf32>
    %5 = arith.addf %2, %4 : vector<1x512xf32>
    %cst_4 = arith.constant 0.000000e+00 : f32
    %6 = vector.broadcast %cst_4 : f32 to vector<1x512xf32>
    %7 = arith.subf %6, %5 : vector<1x512xf32>
    %8 = math.exp %7 : vector<1x512xf32>
    %cst_5 = arith.constant 1.000000e+00 : f32
    %9 = vector.broadcast %cst_5 : f32 to vector<1x512xf32>
    %10 = arith.addf %9, %8 : vector<1x512xf32>
    %11 = tpu.reciprocal %10 {approx = true} : vector<1x512xf32> -> vector<1x512xf32>
    %c0_6 = arith.constant 0 : index
    %c0_7 = arith.constant 0 : index
    %12 = vector.load %arg4[%c0_6, %c0_7] : memref<1x512xf32, #tpu.memory_space<vmem>>, vector<1x512xf32>
    tpu.vector_store %arg4[%c0_6, %c0_7], %11 {strides = array<i32>} : memref<1x512xf32, #tpu.memory_space<vmem>>, vector<1x512xf32>,
    return
  }
  func.func @transform_0(%arg0: i32) -> (i32, i32) {
    %c0_i32 = arith.constant 0 : i32
    %c0_i32_0 = arith.constant 0 : i32
    return %arg0, %c0_i32 : i32, i32
  }
  func.func @transform_1(%arg0: i32) -> (i32, i32) {
    %c0_i32 = arith.constant 0 : i32
    %c0_i32_0 = arith.constant 0 : i32
    %c0_i32_1 = arith.constant 0 : i32
    return %c0_i32, %c0_i32_0 : i32, i32
  }
  func.func @transform_2(%arg0: i32) -> i32 {
    %c0_i32 = arith.constant 0 : i32
    %c0_i32_0 = arith.constant 0 : i32
    return %c0_i32 : i32
  }
  func.func @transform_3(%arg0: i32) -> (i32, i32) {
    %c0_i32 = arith.constant 0 : i32
    %c0_i32_0 = arith.constant 0 : i32
    return %c0_i32, %arg0 : i32, i32
  }
}

</mosaic_0001>

<bundles_post_ra>
// kernel: tpu_custom_call.1
= control target key start
LH: loop header
LB: loop body
LE: loop exit
PB: predicated region body
PF: predicated region fallthrough
CT: control target
= control target key end

     0   :  { %s1025_s0 = inlined_call_operand.hbm [shape: f32[1536,128], index: 0, kind: input, shape index: {}]   ;;  %s1026_s1 = inlined_call_operand.vmem [shape: f32[1,128], index: 1, kind: input, shape index: {}]   ;;  %s1027_s2 = inlined_call_operand.<no memory space> [shape: f32[1], index: 2, kind: input, shape index: {}]   ;;  %s1028_s3 = inlined_call_operand.hbm [shape: f32[1,1536], index: 3, kind: output, shape index: {}]  }
   0x1   :  { %8 = sst [smem:[#allocation2]] %s1027_s2 }
   0x2   :  { %9 = vsyncpa [#allocation4], 0 }
   0x3   :  { %11 = vsyncpa [#allocation4 + $0x1], 0 }
   0x4   :  { %12 = vsyncpa [#allocation5], 0 }
   0x5   :  { %14 = vsyncpa [#allocation5 + $0x1], 0  ;;  %s811_s14 = smov 0   ;;  %s813_s15 = smov 0  }
   0x6   :  { %s815_s16 = smov 0   ;;  %s817_s17 = smov 0  }
   0x7 LB: > { %s832_s2 = sadd.s32 4294967295, %s781_s17   ;;  %s540_s18 = sadd.s32 4294967294, %s781_s17   ;;  %s781_s17 = sphi %s817_s17, %s1042_s17   ;;  %s777_s16 = sphi %s815_s16, %s1041_s16   ;;  %s773_s15 = sphi %s813_s15, %s1040_s15   ;;  %s769_s14 = sphi %s811_s14, %s1039_s14  }
   0x8   : > { %s836_s19 = sadd.s32 1, %s781_s17   ;;  %s27_s20 = sadd.s32 1, %s777_s16 }
   0x9   : > { %s24_s21 = ssub.s32 %s781_s17, %s836_s19  ;;  %p34_p0 = scmp.ne.s32.totalorder %s777_s16, %s773_s15 }
   0xa   : > { %p25_p1 = scmp.eq.s32.totalorder %s24_s21, 0  ;;  %p35_p2 = scmp.eq.s32.totalorder %s781_s17, 0 }
   0xb   : > { %p40_p3 = scmp.ne.s32.totalorder %s773_s15, %s769_s14  ;;  %p41_p4 = scmp.eq.s32.totalorder %s832_s2, 0 }
   0xc   : > { %s848_s22 = scalar_select %p25_p1, %s777_s16, %s27_s20  }
   0xd   : > { %p850_p5 = por %p35_p2, %p34_p0  ;;  %p854_p6 = por %p41_p4, %p40_p3 }
   0xe   : > { %p106_p7 = scmp.eq.s32.totalorder %s832_s2, 2  ;;  %p112_p8 = scmp.eq.s32.totalorder %s540_s18, 2 }
   0xf   : > { %s1032_s24 = scalar_select %p854_p6, 1, 0 }
  0x10   : > { %p636_p9 = scmp.lt.s32.totalorder %s781_s17, 3  ;;  %p860_p10 = por %p106_p7, %p34_p0 }
  0x11   : > { %p864_p11 = por %p112_p8, %p40_p3  ;;  %s138_s27 = sand.u32 1, %s777_s16  }
  0x12   : > { %s1033_s25 = scalar_select %p860_p10, 1, 0 }
  0x13   : > { %s1034_s26 = scalar_select %p864_p11, 1, 0 }
  0x14   : > { %s554_s28 = sshll.u32 %s781_s17, 13  ;;  %s543_s29 = sshll.u32 %s138_s27, 9 }
  0x15   : > { %s873_s5 = scalar_lea.hbm %s1025_s0, %s554_s28  ;;  %s142_s6 = scalar_lea.vmem [#allocation3], %s543_s29 }
  0x16   : > { %s149_s7 = sshll.u32 %s142_s6, 4  ;;  %p877_p12 = pnand %p636_p9, %p850_p5  ;;  %s881_s7 = int_to_ptr.vmem [resolvable:$true] %s149_s7 }
  0x17   : > { %s883_s9 = scalar_lea.sflag [#allocation4], %s138_s27  ;;  %s689_s10 = scalar_lea.hbm %s873_s5, 8192 }
  0x18   : > { %p690_p13 = scmp.ne.s32.totalorder %s873_s5, %s689_s10  ;;  %p691_p0 = pneg %p877_p12 }
  0x19   : > { %s694_s13 = scalar_lea.hbm %s1025_s0, 24576  ;;  %p695_p3 = scmp.lt.s32.totalorder %s873_s5, %s1025_s0 }
  0x1a   : > { %p692_p1 = pnand %p691_p0, %p690_p13  ;;  %p696_p4 = scmp.lt.s32.totalorder %s694_s13, %s689_s10 }
  0x1c   : > { %p693_p2 = pneg %p692_p1  ;;  %p697_p5 = por %p696_p4, %p695_p3 }
  0x1e   : > { %p698_p7 = pnand %p697_p5, %p693_p2 }
  0x20   : > { %701 = shalt.err (!%p698_p7)
}
  0x21   : > { %s702_s21 = scalar_lea.vmem %s881_s7, 8192  ;;  %s783_s23 = smov [#allocation3]  }
  0x22   : > { %p703_p8 = scmp.ne.s32.totalorder %s881_s7, %s702_s21  ;;  %s707_s27 = sshll.u32 %s783_s23, 4  ;;  %s708_s27 = int_to_ptr.vmem [resolvable:$false] %s707_s27 }
  0x23   : > { %s709_s28 = scalar_lea.vmem %s708_s27, 16384  ;;  %p710_p1 = scmp.lt.s32.totalorder %s881_s7, %s708_s27 }
  0x24   : > { %p705_p9 = pnand %p703_p8, %p691_p0  ;;  %p711_p11 = scmp.lt.s32.totalorder %s709_s28, %s702_s21 }
  0x26   : > { %p706_p13 = pneg %p705_p9  ;;  %p712_p10 = por %p711_p11, %p710_p1 }
  0x28   : > { %p713_p6 = pnand %p712_p10, %p706_p13 }
  0x2a   : > { %716 = shalt.err (!%p713_p6)
}
  0x2b   : > { %s784_s29 = smov 128   ;;  %s785_s30 = smov 8  }
  0x2c   : > { %631 = dma.hbm_to_vmem [thread:$0]  (!%p877_p12), %s873_s5, 8192, %s881_s7, %s883_s9, %s784_s29, %s784_s29, %s785_s30  }
  0x2d   : > { %p546_p0 = scmp.ge.s32.totalorder %s781_s17, 1  ;;  %p157_p2 = scmp.lt.s32.totalorder %s781_s17, 4 }
  0x2f   : > { %p158_p3 = pnand %p546_p0, %p157_p2 }
  0x30   : > { %s907_s4 = sand.u32 (!%p158_p3), 1, %s773_s15   ;;  %p1036_p6 = scmp.ne.s32.totalorder (!%p158_p3), %s1032_s24, 0 }
  0x31   : > { %161 = sbr.rel (%p158_p3) target bundleno = 374 (0x176), region = 32  ;;  %s547_s6 = sshll.u32 (!%p158_p3), %s907_s4, 9 }
  0x32   : > { %s164_s10 = scalar_lea.sflag (!%p158_p3), [#allocation4], %s907_s4  ;;  %s911_s11 = scalar_lea.vmem (!%p158_p3), [#allocation3], %s547_s6 }
  0x36   : > { %760 = dma.done.wait (%p1036_p6), %s164_s10, 8192  }
  0x37   : > { %762 = vsyncadd (%p1036_p6), %s164_s10, 4294959104  ;;  %v224_v0 = vld [vmem:[%s911_s11 + $0xf8] sm:$0xff]  ;;  %v223_v4 = vld [vmem:[%s911_s11 + $0xf0] sm:$0xff]  ;;  %s257_s7 = sld [smem:[#allocation2]]  ;;  %s548_s8 = sshll.u32 %s907_s4, 2 }
  0x38   : > { %v256_v1 = vld [vmem:[%s911_s11 + $0x1f8] sm:$0xff]  ;;  %556 = vmatprep.subr.mxu0 %v224_v0  ;;  %v255_v5 = vld [vmem:[%s911_s11 + $0x1f0] sm:$0xff]  ;;  %v222_v8 = vld [vmem:[%s911_s11 + $0xe8] sm:$0xff]  ;;  %s555_s9 = sshll.u32 %s832_s2, 6  ;;  %s189_s12 = scalar_lea.vmem [#allocation6], %s548_s8 }
  0x39   : > { %v208_v2 = vld [vmem:[%s911_s11 + $0x78] sm:$0xff]  ;;  %590 = vmatprep.subr.mxu1 %v256_v1  ;;  %v207_v6 = vld [vmem:[%s911_s11 + $0x70] sm:$0xff]  ;;  %v254_v9 = vld [vmem:[%s911_s11 + $0x1e8] sm:$0xff]  ;;  %s470_s13 = sshll.u32 %s189_s12, 4  ;;  %s468_s21 = scalar_lea.hbm %s1028_s3, %s555_s9  ;;  %s471_s13 = int_to_ptr.vmem [resolvable:$true] %s470_s13 }
  0x3a   : > { %v240_v3 = vld [vmem:[%s911_s11 + $0x178] sm:$0xff]  ;;  %557 = vmatpush3.xpose.msra.mxu0 %v208_v2  ;;  %v239_v7 = vld [vmem:[%s911_s11 + $0x170] sm:$0xff]  ;;  %v206_v10 = vld [vmem:[%s911_s11 + $0x68] sm:$0xff]  ;;  %s456_s23 = scalar_lea.sflag [#allocation5], %s907_s4  ;;  %s717_s27 = scalar_lea.vmem %s471_s13, 64 }
  0x3b   : > { %591 = vmatpush3.xpose.msra.mxu1 %v240_v3  ;;  %558 = vmatprep.subr.mxu0 %v223_v4  ;;  %v238_v11 = vld [vmem:[%s911_s11 + $0x168] sm:$0xff]  ;;  %v221_v12 = vld [vmem:[%s911_s11 + $0xe0] sm:$0xff]  ;;  %v220_v16 = vld [vmem:[%s911_s11 + $0xd8] sm:$0xff]  ;;  %p718_p10 = scmp.ne.s32.totalorder %s471_s13, %s717_s27  ;;  %p1037_p11 = scmp.ne.s32.totalorder %s1033_s25, 0 }
  0x3c   : > { %592 = vmatprep.subr.mxu1 %v255_v5  ;;  %v253_v13 = vld [vmem:[%s911_s11 + $0x1e0] sm:$0xff]  ;;  %v252_v17 = vld [vmem:[%s911_s11 + $0x1d8] sm:$0xff]  ;;  %v219_v20 = vld [vmem:[%s911_s11 + $0xd0] sm:$0xff]  ;;  %s787_s28 = smov [#allocation6]  }
  0x3d   : > { %v205_v14 = vld [vmem:[%s911_s11 + $0x60] sm:$0xff]  ;;  %v204_v18 = vld [vmem:[%s911_s11 + $0x58] sm:$0xff]  ;;  %v251_v21 = vld [vmem:[%s911_s11 + $0x1d0] sm:$0xff]  ;;  %v258_v1 = vstv %s257_s7  ;;  %p719_p12 = pnand %p718_p10, %p1037_p11  ;;  %s721_s29 = sshll.u32 %s787_s28, 4  ;;  %s722_s29 = int_to_ptr.vmem [resolvable:$false] %s721_s29 }
  0x3e   : > { %559 = vmatpush3.xpose.msra.mxu0 %v207_v6  ;;  %v237_v15 = vld [vmem:[%s911_s11 + $0x160] sm:$0xff]  ;;  %v236_v19 = vld [vmem:[%s911_s11 + $0x158] sm:$0xff]  ;;  %v203_v22 = vld [vmem:[%s911_s11 + $0x50] sm:$0xff]  ;;  %s723_s2 = scalar_lea.vmem %s722_s29, 128  ;;  %p724_p5 = scmp.lt.s32.totalorder %s471_s13, %s722_s29 }
  0x3f   : > { %593 = vmatpush3.xpose.msra.mxu1 %v239_v7  ;;  %560 = vmatprep.subr.mxu0 %v222_v8  ;;  %v235_v23 = vld [vmem:[%s911_s11 + $0x150] sm:$0xff]  ;;  %v218_v24 = vld [vmem:[%s911_s11 + $0xc8] sm:$0xff]  ;;  %v946_v26 = vld [vmem:[%s1026_s1] sm:$0x1]  ;;  %p720_p4 = pneg %p719_p12  ;;  %p725_p7 = scmp.lt.s32.totalorder %s723_s2, %s717_s27 }
  0x40   : > { %594 = vmatprep.subr.mxu1 %v254_v9  ;;  %v250_v25 = vld [vmem:[%s911_s11 + $0x1c8] sm:$0xff]  ;;  %v217_v29 = vld [vmem:[%s911_s11 + $0xc0] sm:$0xff]  ;;  %588 = vmatprep.mubr.f32.mxu0 %v946_v26  ;;  %v216_v33 = vld [vmem:[%s911_s11 + $0xb8] sm:$0xff] }
  0x41   : > { %v202_v27 = vld [vmem:[%s911_s11 + $0x48] sm:$0xff]  ;;  %v249_v30 = vld [vmem:[%s911_s11 + $0x1c0] sm:$0xff]  ;;  %622 = vmatprep.mubr.f32.mxu1 %v946_v26  ;;  %v248_v34 = vld [vmem:[%s911_s11 + $0x1b8] sm:$0xff]  ;;  %p726_p8 = por %p725_p7, %p724_p5 }
  0x42   : > { %561 = vmatpush3.xpose.msra.mxu0 %v206_v10  ;;  %v234_v28 = vld [vmem:[%s911_s11 + $0x148] sm:$0xff]  ;;  %v201_v31 = vld [vmem:[%s911_s11 + $0x40] sm:$0xff]  ;;  %v200_v35 = vld [vmem:[%s911_s11 + $0x38] sm:$0xff] }
  0x43   : > { %595 = vmatpush3.xpose.msra.mxu1 %v238_v11  ;;  %562 = vmatprep.subr.mxu0 %v221_v12  ;;  %v233_v32 = vld [vmem:[%s911_s11 + $0x140] sm:$0xff]  ;;  %v232_v36 = vld [vmem:[%s911_s11 + $0x138] sm:$0xff]  ;;  %v215_v37 = vld [vmem:[%s911_s11 + $0xb0] sm:$0xff]  ;;  %p727_p9 = pnand %p726_p8, %p720_p4 }
  0x44   : > { %596 = vmatprep.subr.mxu1 %v253_v13  ;;  %v247_v38 = vld [vmem:[%s911_s11 + $0x1b0] sm:$0xff]  ;;  %v214_v41 = vld [vmem:[%s911_s11 + $0xa8] sm:$0xff]  ;;  %v213_v45 = vld [vmem:[%s911_s11 + $0xa0] sm:$0xff] }
  0x45   : > { %v199_v39 = vld [vmem:[%s911_s11 + $0x30] sm:$0xff]  ;;  %v246_v42 = vld [vmem:[%s911_s11 + $0x1a8] sm:$0xff]  ;;  %v245_v46 = vld [vmem:[%s911_s11 + $0x1a0] sm:$0xff] }
  0x46   : > { %563 = vmatpush3.xpose.msra.mxu0 %v205_v14  ;;  %v231_v40 = vld [vmem:[%s911_s11 + $0x130] sm:$0xff]  ;;  %v198_v43 = vld [vmem:[%s911_s11 + $0x28] sm:$0xff]  ;;  %v197_v47 = vld [vmem:[%s911_s11 + $0x20] sm:$0xff] }
  0x47   : > { %597 = vmatpush3.xpose.msra.mxu1 %v237_v15  ;;  %564 = vmatprep.subr.mxu0 %v220_v16  ;;  %v230_v44 = vld [vmem:[%s911_s11 + $0x128] sm:$0xff]  ;;  %v229_v48 = vld [vmem:[%s911_s11 + $0x120] sm:$0xff]  ;;  %v212_v49 = vld [vmem:[%s911_s11 + $0x98] sm:$0xff] }
  0x48   : > { %598 = vmatprep.subr.mxu1 %v252_v17  ;;  %v244_v50 = vld [vmem:[%s911_s11 + $0x198] sm:$0xff]  ;;  %v211_v53 = vld [vmem:[%s911_s11 + $0x90] sm:$0xff]  ;;  %v210_v57 = vld [vmem:[%s911_s11 + $0x88] sm:$0xff] }
  0x49   : > { %v196_v51 = vld [vmem:[%s911_s11 + $0x18] sm:$0xff]  ;;  %v243_v54 = vld [vmem:[%s911_s11 + $0x190] sm:$0xff]  ;;  %v242_v58 = vld [vmem:[%s911_s11 + $0x188] sm:$0xff] }
  0x4a   : > { %565 = vmatpush3.xpose.msra.mxu0 %v204_v18  ;;  %v228_v52 = vld [vmem:[%s911_s11 + $0x118] sm:$0xff]  ;;  %v195_v55 = vld [vmem:[%s911_s11 + $0x10] sm:$0xff]  ;;  %v194_v59 = vld [vmem:[%s911_s11 + $0x8] sm:$0xff] }
  0x4b   : > { %599 = vmatpush3.xpose.msra.mxu1 %v236_v19  ;;  %566 = vmatprep.subr.mxu0 %v219_v20  ;;  %v227_v56 = vld [vmem:[%s911_s11 + $0x110] sm:$0xff]  ;;  %v226_v60 = vld [vmem:[%s911_s11 + $0x108] sm:$0xff]  ;;  %v209_v61 = vld [vmem:[%s911_s11 + $0x80] sm:$0xff] }
  0x4c   : > { %600 = vmatprep.subr.mxu1 %v251_v21  ;;  %v241_v62 = vld [vmem:[%s911_s11 + $0x180] sm:$0xff] }
  0x4d   : > { %v193_v63 = vld [vmem:[%s911_s11] sm:$0xff] }
  0x4e   : > { %567 = vmatpush3.xpose.msra.mxu0 %v203_v22  ;;  %v225_v0 = vld [vmem:[%s911_s11 + $0x100] sm:$0xff] }
  0x4f   : > { %601 = vmatpush3.xpose.msra.mxu1 %v235_v23  ;;  %568 = vmatprep.subr.mxu0 %v218_v24 }
  0x50   : > { %602 = vmatprep.subr.mxu1 %v250_v25 }
  0x52   : > { %569 = vmatpush3.xpose.msra.mxu0 %v202_v27 }
  0x53   : > { %603 = vmatpush3.xpose.msra.mxu1 %v234_v28  ;;  %570 = vmatprep.subr.mxu0 %v217_v29  ;;  %v430_v28 = vlaneseq }
  0x54   : > { %604 = vmatprep.subr.mxu1 %v249_v30 }
  0x55   : > { %v431_v30 = vshrl.u32 %v430_v28, 7  ;;  %vm452_vm0 = vcmp.lt.s32.totalorder %v430_v28, 512 }
  0x56   : > { %571 = vmatpush3.xpose.msra.mxu0 %v201_v31 }
  0x57   : > { %605 = vmatpush3.xpose.msra.mxu1 %v233_v32  ;;  %572 = vmatprep.subr.mxu0 %v216_v33 }
  0x58   : > { %606 = vmatprep.subr.mxu1 %v248_v34 }
  0x5a   : > { %573 = vmatpush3.xpose.msra.mxu0 %v200_v35 }
  0x5b   : > { %607 = vmatpush3.xpose.msra.mxu1 %v232_v36  ;;  %574 = vmatprep.subr.mxu0 %v215_v37 }
  0x5c   : > { %608 = vmatprep.subr.mxu1 %v247_v38 }
  0x5e   : > { %575 = vmatpush3.xpose.msra.mxu0 %v199_v39 }
  0x5f   : > { %609 = vmatpush3.xpose.msra.mxu1 %v231_v40  ;;  %576 = vmatprep.subr.mxu0 %v214_v41 }
  0x60   : > { %610 = vmatprep.subr.mxu1 %v246_v42 }
  0x62   : > { %577 = vmatpush3.xpose.msra.mxu0 %v198_v43 }
  0x63   : > { %611 = vmatpush3.xpose.msra.mxu1 %v230_v44  ;;  %578 = vmatprep.subr.mxu0 %v213_v45 }
  0x64   : > { %612 = vmatprep.subr.mxu1 %v245_v46 }
  0x66   : > { %579 = vmatpush3.xpose.msra.mxu0 %v197_v47 }
  0x67   : > { %613 = vmatpush3.xpose.msra.mxu1 %v229_v48  ;;  %580 = vmatprep.subr.mxu0 %v212_v49 }
  0x68   : > { %614 = vmatprep.subr.mxu1 %v244_v50 }
  0x6a   : > { %581 = vmatpush3.xpose.msra.mxu0 %v196_v51 }
  0x6b   : > { %615 = vmatpush3.xpose.msra.mxu1 %v228_v52  ;;  %582 = vmatprep.subr.mxu0 %v211_v53 }
  0x6c   : > { %616 = vmatprep.subr.mxu1 %v243_v54 }
  0x6e   : > { %583 = vmatpush3.xpose.msra.mxu0 %v195_v55 }
  0x6f   : > { %617 = vmatpush3.xpose.msra.mxu1 %v227_v56  ;;  %584 = vmatprep.subr.mxu0 %v210_v57 }
  0x70   : > { %618 = vmatprep.subr.mxu1 %v242_v58 }
  0x72   : > { %585 = vmatpush3.xpose.msra.mxu0 %v194_v59 }
  0x73   : > { %619 = vmatpush3.xpose.msra.mxu1 %v226_v60  ;;  %586 = vmatprep.subr.mxu0 %v209_v61 }
  0x74   : > { %620 = vmatprep.subr.mxu1 %v241_v62 }
  0x76   : > { %587 = vmatpush3.xpose.msra.mxu0 %v193_v63 }
  0x77   : > { %621 = vmatpush3.xpose.msra.mxu1 %v225_v0 }
  0x79   : > { %589 = vmatmul.mubr.f32.vlgmr.msra.gmra.mxu0 %v946_v26 }
  0x7a   : > { %623 = vmatmul.mubr.f32.vlgmr.msra.gmra.mxu1 %v946_v26  ;;  %v786_v26 = vmov 1966171168  }
  0x7b   : > { %v428_v27 = vunpack.c.l.s4 %v786_v26 }
  0x7d   : > { %v429_v29 = vunpack.c.0.s8 %v428_v27 }
  0x7f   : > { %v432_v33 = vsub.s32 %v429_v29, %v431_v30 }
 0x139   : > { %v325_v2 = vpop.f32.mrf.mxu0 }
 0x13a   : > { %v396_v3 = vpop.f32.mrf.mxu1  ;;  %v326_v4 = vadd.f32 %v325_v2, %v258_v1 }
 0x13b   : > { %v397_v5 = vadd.f32 %v396_v3, %v258_v1  ;;  %v327_v6 = vpop.f32.mrf.mxu0 }
 0x13c   : > { %v398_v7 = vpop.f32.mrf.mxu1  ;;  %v401_v8 = vsub.f32 0.0, %v326_v4  ;;  %v328_v10 = vadd.f32 %v327_v6, %v258_v1 }
 0x13d   : > { %v403_v9 = vsub.f32 0.0, %v397_v5  ;;  %v399_v11 = vadd.f32 %v398_v7, %v258_v1 }
 0x13e   : > { %v405_v12 = vmul.f32 1.442695, %v401_v8  ;;  %v402_v14 = vsub.f32 0.0, %v328_v10 }
 0x13f   : > { %v409_v13 = vmul.f32 1.442695, %v403_v9  ;;  %v404_v15 = vsub.f32 0.0, %v399_v11 }
 0x140   : > { %673 = vpow2.f32 %v405_v12  ;;  %v407_v16 = vmul.f32 1.442695, %v402_v14 }
 0x141   : > { %v411_v17 = vmul.f32 1.442695, %v404_v15  ;;  %675 = vpow2.f32 %v409_v13 }
 0x142   : > { %677 = vpow2.f32 %v407_v16 }
 0x143   : > { %679 = vpow2.f32 %v411_v17 }
 0x14d   : > { %v674_v18 = vpop.eup %673 }
 0x14e   : > { %v676_v19 = vpop.eup %675  ;;  %v413_v20 = vadd.f32 1.0, %v674_v18 }
 0x14f   : > { %v678_v21 = vpop.eup %677  ;;  %v415_v22 = vadd.f32 1.0, %v676_v19 }
 0x150   : > { %v680_v23 = vpop.eup %679  ;;  %681 = vrcp.f32 %v413_v20  ;;  %v414_v24 = vadd.f32 1.0, %v678_v21 }
 0x151   : > { %683 = vrcp.f32 %v415_v22  ;;  %v416_v25 = vadd.f32 1.0, %v680_v23 }
 0x152   : > { %685 = vrcp.f32 %v414_v24 }
 0x153   : > { %687 = vrcp.f32 %v416_v25 }
 0x15d   : > { %v682_v31 = vpop.eup %681 }
 0x15e   : > { %v684_v32 = vpop.eup %683 }
 0x15f   : > { %v686_v34 = vpop.eup %685 }
 0x160   : > { %v688_v35 = vpop.eup %687  ;;  %v425_v36 = vcombine.low %v682_v31, %v686_v34 }
 0x161   : > { %v426_v37 = vcombine.low %v684_v32, %v688_v35 }
 0x162   : > { %v433_v38 = vrot.slane %v425_v36, %v432_v33 }
 0x163   : > { %v440_v39 = vrot.slane %v426_v37, %v432_v33 }
 0x165   : > { %v441_v40 = vcombine.low %v433_v38, %v440_v39 }
 0x167   : > { %v448_v41 = vrot.slane %v441_v40, %v432_v33 }
 0x169   : > { %454 = vst.msk [vmem:[%s189_s12] sm:$0xf] %vm452_vm0, %v448_v41 }
 0x16a   : > { %730 = shalt.err (!%p727_p9)
}
 0x16b   : > { %s731_s30 = scalar_lea.hbm %s468_s21, 64  ;;  %s735_s10 = scalar_lea.hbm %s1028_s3, 192 }
 0x16c   : > { %p732_p13 = scmp.ne.s32.totalorder %s468_s21, %s731_s30  ;;  %p736_p2 = scmp.lt.s32.totalorder %s468_s21, %s1028_s3 }
 0x16d   : > { %p737_p3 = scmp.lt.s32.totalorder %s735_s10, %s731_s30 }
 0x16e   : > { %p733_p1 = pnand %p732_p13, %p1037_p11 }
 0x16f   : > { %p738_p6 = por %p737_p3, %p736_p2 }
 0x170   : > { %p734_p0 = pneg %p733_p1 }
 0x172   : > { %p739_p10 = pnand %p738_p6, %p734_p0 }
 0x174   : > { %742 = shalt.err (!%p739_p10)
}
 0x175   : > { %626 = dma.vmem_to_hbm [thread:$0]  (%p1037_p11), %s471_s13, 64, %s468_s21, %s456_s23  }
 0x176 PF: > { %p637_p12 = scmp.ge.s32.totalorder %s781_s17, 2  ;;  %s482_s5 = sand.u32 1, %s769_s14  }
 0x177   : > { %p1038_p4 = scmp.ne.s32.totalorder %s1034_s26, 0  ;;  %s483_s7 = scalar_lea.sflag [#allocation5], %s482_s5 }
 0x179   : > { %p633_p5 = pnand %p637_p12, %p1038_p4 }
 0x17b   : > { %p634_p7 = pneg %p633_p5 }
 0x17d   : > { %764 = dma.done.wait (%p634_p7), %s483_s7, 64  }
 0x17e   : > { %766 = vsyncadd (%p634_p7), %s483_s7, 4294967232  ;;  %p17_p8 = scmp.ge.s32.totalorder %s836_s19, 5   ;;  %s1039_s14 = smov %s773_s15 }
 0x17f   : > { %s1040_s15 = smov %s777_s16  ;;  %s1041_s16 = smov %s848_s22 }
 0x180   : > { %s1042_s17 = smov %s836_s19  ;;  %19 = sbr.rel (!%p17_p8) target bundleno = 7 (0x7), region = 77 }
 0x185   :  { %488 = vsyncpa [#allocation4], 1 }
 0x186   :  { %490 = vsyncpa [#allocation4 + $0x1], 1 }
 0x187   :  { %491 = vsyncpa [#allocation5], 1 }
 0x188   :  { %493 = vsyncpa [#allocation5 + $0x1], 1 }

</bundles_post_ra>
